<compile_context>
chip_gen: v6e
topology: v6e:2x2x1
jax: 0.10.0
libtpu: 0.0.40
codegen_flags: <defaults>
</compile_context>

<pallas_src>
import functools

import jax
import jax.numpy as jnp
from jax import lax
from jax.experimental import pallas as pl
from jax.experimental.pallas import tpu as pltpu


# --------------------------------------------------------------------------- #
# Kernel 1: tiled global-average-pool + fc + L2 normalize (per image stream)  #
# --------------------------------------------------------------------------- #
def _pool_fc_norm_kernel(x1_ref, x2_ref, w_ref, b_ref, q_ref, k_ref,
                         acc1_ref, acc2_ref, *, hw_total):
    """Grid = (batch_tiles, hw_tiles); hw is the reduction axis (last).

    x1_ref, x2_ref : (tb, C, thw)  input tiles (im_1 / im_2 streams)
    w_ref          : (C, D)        fc weight, pre-transposed
    b_ref          : (1, D)        fc bias
    q_ref, k_ref   : (tb, D)       normalized features (outputs)
    acc1/acc2      : (tb, C, thw)  f32 lane-resident partial-sum accumulators
    """
    hi = pl.program_id(1)

    @pl.when(hi == 0)
    def _init():
        acc1_ref[...] = jnp.zeros_like(acc1_ref)
        acc2_ref[...] = jnp.zeros_like(acc2_ref)

    # Pure VPU adds; fully hidden under the next tile's DMA (mem-bound).
    acc1_ref[...] += x1_ref[...].astype(jnp.float32)
    acc2_ref[...] += x2_ref[...].astype(jnp.float32)

    @pl.when(hi == pl.num_programs(1) - 1)
    def _finalize():
        inv_hw = jnp.float32(1.0 / hw_total)
        # One small XLU lane reduction per output tile, not per input tile.
        pooled_q = jnp.sum(acc1_ref[...], axis=-1) * inv_hw        # (tb, C)
        pooled_k = jnp.sum(acc2_ref[...], axis=-1) * inv_hw        # (tb, C)

        w = w_ref[...].astype(jnp.float32)                         # (C, D)
        b = b_ref[...].astype(jnp.float32)                         # (1, D)
        fq = jnp.dot(pooled_q, w, preferred_element_type=jnp.float32) + b
        fk = jnp.dot(pooled_k, w, preferred_element_type=jnp.float32) + b

        # F.normalize(x, dim=1); clamp on squared norm ~ torch's 1e-12 on norm.
        fq = fq * lax.rsqrt(jnp.maximum(
            jnp.sum(fq * fq, axis=-1, keepdims=True), 1e-24))
        fk = fk * lax.rsqrt(jnp.maximum(
            jnp.sum(fk * fk, axis=-1, keepdims=True), 1e-24))

        q_ref[...] = fq
        k_ref[...] = fk


# --------------------------------------------------------------------------- #
# Kernel 2: logits = (q @ k.T) / temp   (q row-tiled, k fully resident)       #
# --------------------------------------------------------------------------- #
def _logits_kernel(q_ref, k_ref, out_ref, *, inv_temp):
    # Contract the last dims directly -- no in-kernel transpose of k.
    logits = lax.dot_general(
        q_ref[...], k_ref[...],
        dimension_numbers=(((1,), (1,)), ((), ())),
        preferred_element_type=jnp.float32)
    out_ref[...] = logits * jnp.float32(inv_temp)


# --------------------------------------------------------------------------- #
# Tile selection                                                              #
# --------------------------------------------------------------------------- #
def _pick_batch_tile(bsz):
    # Batch tile must be a multiple of 8 (it lands on the sublane axis of the
    # (tb, D) output block) or equal the full batch.
    if bsz <= 8 or bsz % 8 != 0:
        return bsz
    for cand in (128, 64, 32, 16, 8):
        if bsz % cand == 0:
            return cand
    return bsz


def _pick_hw_tile(hw, tb, c, elem_bytes, vmem_budget_bytes=16 * 1024 * 1024):
    """Largest lane-aligned divisor of hw whose working set fits the budget.

    Working set per step ~ 2 streams x (2x double-buffered input tile + f32
    accumulator).  The budget keeps us comfortably under v7x's 64 MiB physical
    VMEM even with pipelining headroom; bigger tiles = fewer ~0.35us grid
    steps and better DMA efficiency.
    """
    if hw % 128 != 0:
        return hw                       # small / irregular spatial: one tile

    def cost(t):
        return 2 * tb * c * t * (2 * elem_bytes + 4)

    best = 128
    t = 256
    while t <= hw:
        if hw % t == 0 and cost(t) <= vmem_budget_bytes:
            best = t
        t += 128
    return best


def _pick_logits_row_tile(bsz):
    # Rows of the logits matrix; keep the whole k / full output row (lane
    # dense, multiple of 128 or full extent) resident.
    if bsz <= 128 or bsz % 128 != 0:
        return bsz
    for cand in (512, 256, 128):
        if bsz % cand == 0:
            return cand
    return bsz


# --------------------------------------------------------------------------- #
# Forward wrapper (default-config Builder.forward)                            #
# --------------------------------------------------------------------------- #
def builder_forward(im_1, im_2, w_fc, b_fc, *, temp=0.2):
    """Returns (logits, labels, loss=None) like the default npair path."""
    assert im_1.shape == im_2.shape
    bsz, c, h, w = im_1.shape
    hw = h * w
    dim_out, dim_in = w_fc.shape
    assert dim_in == c

    # No host-side concat: im_1 / im_2 go to the kernel as the q / k streams.
    x1 = im_1.reshape(bsz, c, hw)
    x2 = im_2.reshape(bsz, c, hw)

    # Pre-transpose fc weight once so the kernel feeds the MXU directly.
    w_t = jnp.transpose(w_fc).astype(jnp.float32)          # (C, D)
    b2d = b_fc.reshape(1, dim_out).astype(jnp.float32)     # (1, D)

    tb = _pick_batch_tile(bsz)
    thw = _pick_hw_tile(hw, tb, c, x1.dtype.itemsize)
    grid = (bsz // tb, hw // thw)

    vmem_cap = 48 * 1024 * 1024   # explicit limit with headroom (v7x: 64 MiB)

    feat_kernel = functools.partial(_pool_fc_norm_kernel, hw_total=hw)

    q_feats, k_feats = pl.pallas_call(
        feat_kernel,
        out_shape=(jax.ShapeDtypeStruct((bsz, dim_out), jnp.float32),
                   jax.ShapeDtypeStruct((bsz, dim_out), jnp.float32)),
        grid=grid,
        in_specs=[
            pl.BlockSpec((tb, c, thw), lambda bi, hi: (bi, 0, hi)),
            pl.BlockSpec((tb, c, thw), lambda bi, hi: (bi, 0, hi)),
            pl.BlockSpec((c, dim_out), lambda bi, hi: (0, 0)),
            pl.BlockSpec((1, dim_out), lambda bi, hi: (0, 0)),
        ],
        out_specs=(
            pl.BlockSpec((tb, dim_out), lambda bi, hi: (bi, 0)),
            pl.BlockSpec((tb, dim_out), lambda bi, hi: (bi, 0)),
        ),
        scratch_shapes=[
            pltpu.VMEM((tb, c, thw), jnp.float32),
            pltpu.VMEM((tb, c, thw), jnp.float32),
        ],
        compiler_params=pltpu.CompilerParams(
            dimension_semantics=("parallel", "arbitrary"),
            vmem_limit_bytes=vmem_cap),
    )(x1, x2, w_t, b2d)

    # Logits: row-tile q / the output, keep k fully resident.
    tm = _pick_logits_row_tile(bsz)
    logits = pl.pallas_call(
        functools.partial(_logits_kernel, inv_temp=1.0 / temp),
        out_shape=jax.ShapeDtypeStruct((bsz, bsz), jnp.float32),
        grid=(bsz // tm,),
        in_specs=[
            pl.BlockSpec((tm, dim_out), lambda i: (i, 0)),
            pl.BlockSpec((bsz, dim_out), lambda i: (0, 0)),
        ],
        out_specs=pl.BlockSpec((tm, bsz), lambda i: (i, 0)),
        compiler_params=pltpu.CompilerParams(
            dimension_semantics=("parallel",),
            vmem_limit_bytes=vmem_cap),
    )(q_feats, k_feats)

    labels = jnp.arange(bsz, dtype=jnp.int32)
    loss = None  # criterion is None in the default forward call
    return logits, labels, loss


if __name__ == "__main__":
    # Small, deterministic example consistent with the module's conventions.
    B, C, H, W = 2, 4, 16, 16         # batch, in_channels, spatial
    DIM = 128                         # Builder default projection dim

    key = jax.random.PRNGKey(0)
    k1, k2, k3, k4 = jax.random.split(key, 4)

    im_1 = jax.random.normal(k1, (B, C, H, W), dtype=jnp.float32)
    im_2 = jax.random.normal(k2, (B, C, H, W), dtype=jnp.float32)

    # Deterministic synthetic encoder fc params: Linear(C -> DIM), torch layout.
    w_fc = 0.1 * jax.random.normal(k3, (DIM, C), dtype=jnp.float32)
    b_fc = 0.01 * jax.random.normal(k4, (DIM,), dtype=jnp.float32)

    logits, labels, loss = builder_forward(im_1, im_2, w_fc, b_fc, temp=0.2)
    jax.block_until_ready(logits)
    jax.block_until_ready(labels)

    assert logits.shape == (B, B)
    assert labels.shape == (B,)
    assert loss is None
    print("KERNEL_OK")
</pallas_src>

<mosaic_0001>
module attributes {stable_mosaic.version = 11 : i64} {
  func.func @_pool_fc_norm_kernel(%arg0: i32, %arg1: i32, %arg2: memref<2x4x256xf32, #tpu.memory_space<vmem>>, %arg3: memref<2x4x256xf32, #tpu.memory_space<vmem>>, %arg4: memref<4x128xf32, #tpu.memory_space<vmem>>, %arg5: memref<1x128xf32, #tpu.memory_space<vmem>>, %arg6: memref<2x128xf32, #tpu.memory_space<vmem>>, %arg7: memref<2x128xf32, #tpu.memory_space<vmem>>, %arg8: memref<2x4x256xf32, #tpu.memory_space<vmem>>, %arg9: memref<2x4x256xf32, #tpu.memory_space<vmem>>) attributes {dimension_semantics = [#tpu.dimension_semantics<parallel>, #tpu.dimension_semantics<arbitrary>], iteration_bounds = array<i64: 1, 1>, scalar_prefetch = 0 : i64, scratch_operands = 2 : i64, tpu.core_type = #tpu.core_type<tc>, window_params = [{transform_indices = @transform_0, window_bounds = array<i64: 2, 4, 256>}, {transform_indices = @transform_1, window_bounds = array<i64: 2, 4, 256>}, {pipeline_mode = #tpu.pipeline_mode<synchronous>, transform_indices = @transform_2, window_bounds = array<i64: 4, 128>}, {pipeline_mode = #tpu.pipeline_mode<synchronous>, transform_indices = @transform_3, window_bounds = array<i64: 1, 128>}, {transform_indices = @transform_4, window_bounds = array<i64: 2, 128>}, {transform_indices = @transform_5, window_bounds = array<i64: 2, 128>}]} {
    %c0_i32 = arith.constant 0 : i32
    %0 = arith.cmpi eq, %arg1, %c0_i32 : i32
    %1 = arith.extui %0 : i1 to i32
    %c0_i32_0 = arith.constant 0 : i32
    %2 = arith.cmpi ne, %1, %c0_i32_0 : i32
    scf.if %2 {
      %cst = arith.constant 0.000000e+00 : f32
      %14 = vector.broadcast %cst : f32 to vector<2x4x256xf32>
      %c0_20 = arith.constant 0 : index
      %c0_21 = arith.constant 0 : index
      %c0_22 = arith.constant 0 : index
      %15 = vector.load %arg8[%c0_20, %c0_21, %c0_22] : memref<2x4x256xf32, #tpu.memory_space<vmem>>, vector<2x4x256xf32>
      tpu.vector_store %arg8[%c0_20, %c0_21, %c0_22], %14 {strides = array<i32>} : memref<2x4x256xf32, #tpu.memory_space<vmem>>, vector<2x4x256xf32>,
      %cst_23 = arith.constant 0.000000e+00 : f32
      %16 = vector.broadcast %cst_23 : f32 to vector<2x4x256xf32>
      %c0_24 = arith.constant 0 : index
      %c0_25 = arith.constant 0 : index
      %c0_26 = arith.constant 0 : index
      %17 = vector.load %arg9[%c0_24, %c0_25, %c0_26] : memref<2x4x256xf32, #tpu.memory_space<vmem>>, vector<2x4x256xf32>
      tpu.vector_store %arg9[%c0_24, %c0_25, %c0_26], %16 {strides = array<i32>} : memref<2x4x256xf32, #tpu.memory_space<vmem>>, vector<2x4x256xf32>,
    } else {
    }
    %c0 = arith.constant 0 : index
    %c0_1 = arith.constant 0 : index
    %c0_2 = arith.constant 0 : index
    %3 = vector.load %arg8[%c0, %c0_1, %c0_2] : memref<2x4x256xf32, #tpu.memory_space<vmem>>, vector<2x4x256xf32>
    %c0_3 = arith.constant 0 : index
    %c0_4 = arith.constant 0 : index
    %c0_5 = arith.constant 0 : index
    %4 = vector.load %arg2[%c0_3, %c0_4, %c0_5] : memref<2x4x256xf32, #tpu.memory_space<vmem>>, vector<2x4x256xf32>
    %5 = arith.addf %3, %4 : vector<2x4x256xf32>
    %c0_6 = arith.constant 0 : index
    %c0_7 = arith.constant 0 : index
    %c0_8 = arith.constant 0 : index
    %6 = vector.load %arg8[%c0_6, %c0_7, %c0_8] : memref<2x4x256xf32, #tpu.memory_space<vmem>>, vector<2x4x256xf32>
    tpu.vector_store %arg8[%c0_6, %c0_7, %c0_8], %5 {strides = array<i32>} : memref<2x4x256xf32, #tpu.memory_space<vmem>>, vector<2x4x256xf32>,
    %c0_9 = arith.constant 0 : index
    %c0_10 = arith.constant 0 : index
    %c0_11 = arith.constant 0 : index
    %7 = vector.load %arg9[%c0_9, %c0_10, %c0_11] : memref<2x4x256xf32, #tpu.memory_space<vmem>>, vector<2x4x256xf32>
    %c0_12 = arith.constant 0 : index
    %c0_13 = arith.constant 0 : index
    %c0_14 = arith.constant 0 : index
    %8 = vector.load %arg3[%c0_12, %c0_13, %c0_14] : memref<2x4x256xf32, #tpu.memory_space<vmem>>, vector<2x4x256xf32>
    %9 = arith.addf %7, %8 : vector<2x4x256xf32>
    %c0_15 = arith.constant 0 : index
    %c0_16 = arith.constant 0 : index
    %c0_17 = arith.constant 0 : index
    %10 = vector.load %arg9[%c0_15, %c0_16, %c0_17] : memref<2x4x256xf32, #tpu.memory_space<vmem>>, vector<2x4x256xf32>
    tpu.vector_store %arg9[%c0_15, %c0_16, %c0_17], %9 {strides = array<i32>} : memref<2x4x256xf32, #tpu.memory_space<vmem>>, vector<2x4x256xf32>,
    %c0_i32_18 = arith.constant 0 : i32
    %11 = arith.cmpi eq, %arg1, %c0_i32_18 : i32
    %12 = arith.extui %11 : i1 to i32
    %c0_i32_19 = arith.constant 0 : i32
    %13 = arith.cmpi ne, %12, %c0_i32_19 : i32
    scf.if %13 {
      %c0_20 = arith.constant 0 : index
      %c0_21 = arith.constant 0 : index
      %c0_22 = arith.constant 0 : index
      %14 = vector.load %arg8[%c0_20, %c0_21, %c0_22] : memref<2x4x256xf32, #tpu.memory_space<vmem>>, vector<2x4x256xf32>
      %cst = arith.constant dense<0.000000e+00> : vector<2x4xf32>
      %15 = vector.multi_reduction <add>, %14, %cst [2] : vector<2x4x256xf32> to vector<2x4xf32>
      %cst_23 = arith.constant 3.906250e-03 : f32
      %16 = vector.broadcast %cst_23 : f32 to vector<2x4xf32>
      %17 = arith.mulf %15, %16 : vector<2x4xf32>
      %c0_24 = arith.constant 0 : index
      %c0_25 = arith.constant 0 : index
      %c0_26 = arith.constant 0 : index
      %18 = vector.load %arg9[%c0_24, %c0_25, %c0_26] : memref<2x4x256xf32, #tpu.memory_space<vmem>>, vector<2x4x256xf32>
      %cst_27 = arith.constant dense<0.000000e+00> : vector<2x4xf32>
      %19 = vector.multi_reduction <add>, %18, %cst_27 [2] : vector<2x4x256xf32> to vector<2x4xf32>
      %cst_28 = arith.constant 3.906250e-03 : f32
      %20 = vector.broadcast %cst_28 : f32 to vector<2x4xf32>
      %21 = arith.mulf %19, %20 : vector<2x4xf32>
      %c0_29 = arith.constant 0 : index
      %c0_30 = arith.constant 0 : index
      %22 = vector.load %arg4[%c0_29, %c0_30] : memref<4x128xf32, #tpu.memory_space<vmem>>, vector<4x128xf32>
      %c0_31 = arith.constant 0 : index
      %c0_32 = arith.constant 0 : index
      %23 = vector.load %arg5[%c0_31, %c0_32] : memref<1x128xf32, #tpu.memory_space<vmem>>, vector<1x128xf32>
      %cst_33 = arith.constant dense<0.000000e+00> : vector<2x128xf32>
      %24 = tpu.matmul %17, %22, %cst_33 {dimension_numbers = #tpu.dot_dimension_numbers<[1], [0], [0], [1], [0, 0, 1, 1], [], []>} : vector<2x4xf32>, vector<4x128xf32>, vector<2x128xf32> -> vector<2x128xf32>
      %25 = vector.broadcast %23 : vector<1x128xf32> to vector<2x128xf32>
      %26 = arith.addf %24, %25 : vector<2x128xf32>
      %cst_34 = arith.constant dense<0.000000e+00> : vector<2x128xf32>
      %27 = tpu.matmul %21, %22, %cst_34 {dimension_numbers = #tpu.dot_dimension_numbers<[1], [0], [0], [1], [0, 0, 1, 1], [], []>} : vector<2x4xf32>, vector<4x128xf32>, vector<2x128xf32> -> vector<2x128xf32>
      %28 = vector.broadcast %23 : vector<1x128xf32> to vector<2x128xf32>
      %29 = arith.addf %27, %28 : vector<2x128xf32>
      %30 = arith.mulf %26, %26 : vector<2x128xf32>
      %cst_35 = arith.constant dense<0.000000e+00> : vector<2xf32>
      %31 = vector.multi_reduction <add>, %30, %cst_35 [1] : vector<2x128xf32> to vector<2xf32>
      %32 = vector.shape_cast %31 : vector<2xf32> to vector<2x1xf32>
      %cst_36 = arith.constant 1.000000e-24 : f32
      %33 = vector.broadcast %cst_36 : f32 to vector<2x1xf32>
      %34 = arith.maximumf %32, %33 : vector<2x1xf32>
      %35 = math.rsqrt %34 : vector<2x1xf32>
      %36 = vector.broadcast %35 : vector<2x1xf32> to vector<2x128xf32>
      %37 = arith.mulf %26, %36 : vector<2x128xf32>
      %38 = arith.mulf %29, %29 : vector<2x128xf32>
      %cst_37 = arith.constant dense<0.000000e+00> : vector<2xf32>
      %39 = vector.multi_reduction <add>, %38, %cst_37 [1] : vector<2x128xf32> to vector<2xf32>
      %40 = vector.shape_cast %39 : vector<2xf32> to vector<2x1xf32>
      %cst_38 = arith.constant 1.000000e-24 : f32
      %41 = vector.broadcast %cst_38 : f32 to vector<2x1xf32>
      %42 = arith.maximumf %40, %41 : vector<2x1xf32>
      %43 = math.rsqrt %42 : vector<2x1xf32>
      %44 = vector.broadcast %43 : vector<2x1xf32> to vector<2x128xf32>
      %45 = arith.mulf %29, %44 : vector<2x128xf32>
      %c0_39 = arith.constant 0 : index
      %c0_40 = arith.constant 0 : index
      %46 = vector.load %arg6[%c0_39, %c0_40] : memref<2x128xf32, #tpu.memory_space<vmem>>, vector<2x128xf32>
      tpu.vector_store %arg6[%c0_39, %c0_40], %37 {strides = array<i32>} : memref<2x128xf32, #tpu.memory_space<vmem>>, vector<2x128xf32>,
      %c0_41 = arith.constant 0 : index
      %c0_42 = arith.constant 0 : index
      %47 = vector.load %arg7[%c0_41, %c0_42] : memref<2x128xf32, #tpu.memory_space<vmem>>, vector<2x128xf32>
      tpu.vector_store %arg7[%c0_41, %c0_42], %45 {strides = array<i32>} : memref<2x128xf32, #tpu.memory_space<vmem>>, vector<2x128xf32>,
    } else {
    }
    return
  }
  func.func @transform_0(%arg0: i32, %arg1: i32) -> (i32, i32, i32) {
    %c0_i32 = arith.constant 0 : i32
    %c0_i32_0 = arith.constant 0 : i32
    return %arg0, %c0_i32, %arg1 : i32, i32, i32
  }
  func.func @transform_1(%arg0: i32, %arg1: i32) -> (i32, i32, i32) {
    %c0_i32 = arith.constant 0 : i32
    %c0_i32_0 = arith.constant 0 : i32
    return %arg0, %c0_i32, %arg1 : i32, i32, i32
  }
  func.func @transform_2(%arg0: i32, %arg1: i32) -> (i32, i32) {
    %c0_i32 = arith.constant 0 : i32
    %c0_i32_0 = arith.constant 0 : i32
    %c0_i32_1 = arith.constant 0 : i32
    return %c0_i32, %c0_i32_0 : i32, i32
  }
  func.func @transform_3(%arg0: i32, %arg1: i32) -> (i32, i32) {
    %c0_i32 = arith.constant 0 : i32
    %c0_i32_0 = arith.constant 0 : i32
    %c0_i32_1 = arith.constant 0 : i32
    return %c0_i32, %c0_i32_0 : i32, i32
  }
  func.func @transform_4(%arg0: i32, %arg1: i32) -> (i32, i32) {
    %c0_i32 = arith.constant 0 : i32
    %c0_i32_0 = arith.constant 0 : i32
    return %arg0, %c0_i32 : i32, i32
  }
  func.func @transform_5(%arg0: i32, %arg1: i32) -> (i32, i32) {
    %c0_i32 = arith.constant 0 : i32
    %c0_i32_0 = arith.constant 0 : i32
    return %arg0, %c0_i32 : i32, i32
  }
}

</mosaic_0001>

<bundles_post_ra>
// kernel: tpu_custom_call.1
= control target key start
LH: loop header
LB: loop body
LE: loop exit
PB: predicated region body
PF: predicated region fallthrough
CT: control target
= control target key end

     0   :  { %11 = vsyncpa [#allocation5], 0  ;;  %s567_s0 = inlined_call_operand.hbm [shape: f32[2,4,256], index: 0, kind: input, shape index: {}]   ;;  %s568_s1 = inlined_call_operand.hbm [shape: f32[2,4,256], index: 1, kind: input, shape index: {}]   ;;  %s569_s2 = inlined_call_operand.hbm [shape: f32[4,128], index: 2, kind: input, shape index: {}]   ;;  %s570_s3 = inlined_call_operand.vmem [shape: f32[1,128], index: 3, kind: input, shape index: {}]   ;;  %s571_s4 = inlined_call_operand.hbm [shape: f32[2,128], index: 4, kind: output, shape index: {0}]   ;;  %s572_s5 = inlined_call_operand.hbm [shape: f32[2,128], index: 5, kind: output, shape index: {1}]  }
   0x1   :  { %12 = vsyncpa [#allocation8], 0 }
   0x2   :  { %13 = vsyncpa [#allocation6], 0 }
   0x3   :  { %14 = vsyncpa [#allocation12], 0  ;;  %s500_s18 = smov [#allocation7]   ;;  %s501_s20 = smov [#allocation4]  }
   0x4   :  { %s32_s19 = sshll.u32 %s500_s18, 4  ;;  %s20_s21 = sshll.u32 %s501_s20, 4  ;;  %s33_s19 = int_to_ptr.vmem [resolvable:$true] %s32_s19  ;;  %s21_s21 = int_to_ptr.vmem [resolvable:$true] %s20_s21 }
   0x5   :  { %s400_s22 = scalar_lea.vmem %s33_s19, 256  ;;  %p405_p1 = scmp.lt.s32.totalorder %s33_s19, %s33_s19 }
   0x6   :  { %p401_p0 = scmp.ne.s32.totalorder %s33_s19, %s400_s22  ;;  %p406_p2 = scmp.lt.s32.totalorder %s400_s22, %s400_s22 }
   0x8   :  { %p407_p3 = por %p406_p2, %p405_p1 }
   0xa   :  { %p408_p4 = pnand %p407_p3, %p401_p0 }
   0xc   :  { %411 = shalt.err (!%p408_p4)
}
   0xd   :  { %s502_s23 = smov 128   ;;  %s503_s24 = smov 8  }
   0xe   :  { %38 = dma.hbm_to_vmem [thread:$0]  %s568_s1, 256, %s33_s19, [#allocation8], %s502_s23, %s502_s23, %s503_s24  }
   0xf   :  { %s420_s27 = scalar_lea.vmem %s21_s21, 256  ;;  %p425_p6 = scmp.lt.s32.totalorder %s21_s21, %s21_s21 }
  0x10   :  { %p421_p5 = scmp.ne.s32.totalorder %s21_s21, %s420_s27  ;;  %p426_p7 = scmp.lt.s32.totalorder %s420_s27, %s420_s27 }
  0x12   :  { %p427_p8 = por %p426_p7, %p425_p6 }
  0x14   :  { %p428_p9 = pnand %p427_p8, %p421_p5 }
  0x16   :  { %431 = shalt.err (!%p428_p9)
}
  0x17   :  { %26 = dma.hbm_to_vmem [thread:$0]  %s567_s0, 256, %s21_s21, [#allocation5], %s502_s23, %s502_s23, %s503_s24  }
  0x18   :  { %s504_s30 = smov [#allocation9]  }
  0x19   :  { %s45_s6 = sshll.u32 %s504_s30, 4  ;;  %s46_s6 = int_to_ptr.vmem [resolvable:$true] %s45_s6 }
  0x1a   :  { %s440_s7 = scalar_lea.vmem %s46_s6, 64  ;;  %p445_p11 = scmp.lt.s32.totalorder %s46_s6, %s46_s6 }
  0x1b   :  { %p441_p10 = scmp.ne.s32.totalorder %s46_s6, %s440_s7  ;;  %p446_p12 = scmp.lt.s32.totalorder %s440_s7, %s440_s7 }
  0x1d   :  { %p447_p13 = por %p446_p12, %p445_p11 }
  0x1f   :  { %p448_p0 = pnand %p447_p13, %p441_p10 }
  0x21   :  { %451 = shalt.err (!%p448_p0)
}
  0x22   :  { %48 = dma.hbm_to_vmem [thread:$0]  %s569_s2, 64, %s46_s6, [#allocation8]  }
  0x23   :  { %492 = dma.done.wait [#allocation5], 256  }
  0x24   :  { %493 = vsyncadd [#allocation5], 4294967040 }
  0x25   :  { %494 = dma.done.wait [#allocation8], 320  }
  0x26   :  { %495 = vsyncadd [#allocation8], 4294966976  ;;  %vm95_vm0 = vcmask 1043456   ;;  %v78_v0 = vld [vmem:[#allocation7] sm:$0xff]  ;;  %v70_v1 = vld [vmem:[#allocation4] sm:$0xff]  ;;  %v505_v21 = vmov 0.0   ;;  %v138_v22 = vlaneseq }
  0x27   :  { %v79_v2 = vld [vmem:[#allocation7 + $0x8] sm:$0xff]  ;;  %v112_v3 = vcombine.high %v78_v0, %v78_v0  ;;  %v116_v4 = vsel %vm95_vm0, %v78_v0, 0.0  ;;  %v91_v5 = vcombine.high %v70_v1, %v70_v1  ;;  %v96_v6 = vsel %vm95_vm0, %v70_v1, 0.0  ;;  %v71_v7 = vld [vmem:[#allocation4 + $0x8] sm:$0xff]  ;;  %v128_v20 = vld [vmem:[#allocation9] sm:$0xf]  ;;  %365 = vmatprep.subr.mxu0 %v505_v21  ;;  %370 = vmatprep.subr.mxu1 %v505_v21 }
  0x28   :  { %v113_v8 = vcombine.high %v79_v2, %v79_v2  ;;  %v92_v9 = vcombine.high %v71_v7, %v71_v7  ;;  %v121_v12 = vsel %vm95_vm0, %v79_v2, 0.0  ;;  %v101_v13 = vsel %vm95_vm0, %v71_v7, 0.0  ;;  %366 = vmatpush3.msk.msra.mxu0 %vm95_vm0, %v128_v20  ;;  %371 = vmatpush3.msk.msra.mxu1 %vm95_vm0, %v128_v20  ;;  %v356_v40 = vld [vmem:[%s570_s3] ss:$0 sm:$0xff]  ;;  %s507_s3 = smov [#allocation11]   ;;  %s508_s10 = smov [#allocation10]  }
  0x29   :  { %v117_v10 = vsel %vm95_vm0, %v112_v3, 0.0  ;;  %v97_v11 = vsel %vm95_vm0, %v91_v5, 0.0  ;;  %vm506_vm1 = vmmov 0   ;;  %v139_v23 = vand.u32 127, %v138_v22  ;;  %s342_s9 = sshll.u32 %s507_s3, 4  ;;  %s332_s11 = sshll.u32 %s508_s10, 4  ;;  %s343_s9 = int_to_ptr.vmem [resolvable:$true] %s342_s9  ;;  %s333_s11 = int_to_ptr.vmem [resolvable:$true] %s332_s11 }
  0x2a   :  { %v118_v14 = vadd.f32 %v117_v10, %v116_v4  ;;  %v98_v15 = vadd.f32 %v97_v11, %v96_v6  ;;  %v122_v16 = vsel %vm95_vm0, %v113_v8, 0.0  ;;  %v102_v17 = vsel %vm95_vm0, %v92_v9, 0.0  ;;  %367 = vmatprep.mubr.msk.f32.mxu0 %vm506_vm1, %v505_v21  ;;  %372 = vmatprep.mubr.msk.f32.mxu1 %vm506_vm1, %v505_v21  ;;  %s452_s12 = scalar_lea.vmem %s343_s9, 32  ;;  %p457_p2 = scmp.lt.s32.totalorder %s343_s9, %s343_s9 }
  0x2b   :  { %v123_v18 = vadd.f32 %v122_v16, %v121_v12  ;;  %v103_v19 = vadd.f32 %v102_v17, %v101_v13  ;;  %v141_v24 = vshrl.u32 %v138_v22, 7  ;;  %vm148_vm2 = vcmask 1041409   ;;  %p453_p1 = scmp.ne.s32.totalorder %s343_s9, %s452_s12  ;;  %p458_p3 = scmp.lt.s32.totalorder %s452_s12, %s452_s12 }
  0x2c   :  { %119 = vadd.xlane.f32.xlu1 %v118_v14  ;;  %99 = vadd.xlane.f32.xlu0 %v98_v15  ;;  %vm150_vm3 = vcmask 31744   ;;  %vm310_vm4 = vcmask 1041408  }
  0x2d   :  { %v142_v27 = vsub.s32 %v139_v23, %v141_v24  ;;  %p459_p4 = por %p458_p3, %p457_p2 }
  0x2f   :  { %p460_p5 = pnand %p459_p4, %p453_p1 }
  0x30   :  { %124 = vadd.xlane.f32.xlu1 %v123_v18  ;;  %104 = vadd.xlane.f32.xlu0 %v103_v19 }
  0xb5   :  { %v120_v25 = vpop.xlane.xlu1 %119  ;;  %v100_v26 = vpop.xlane.xlu0 %99 }
  0xb6   :  { %v126_v28 = vmul.f32 0.00390625, %v120_v25  ;;  %v106_v29 = vmul.f32 0.00390625, %v100_v26 }
  0xb8   :  { %v231_v34 = vrot.slane %v126_v28, %v142_v27  ;;  %v143_v35 = vrot.slane %v106_v29, %v142_v27 }
  0xb9   :  { %v125_v30 = vpop.xlane.xlu1 %124  ;;  %v105_v31 = vpop.xlane.xlu0 %104 }
  0xba   :  { %v127_v32 = vmul.f32 0.00390625, %v125_v30  ;;  %v107_v33 = vmul.f32 0.00390625, %v105_v31 }
  0xbc   :  { %v235_v36 = vrot.slane %v127_v32, %v142_v27  ;;  %v147_v37 = vrot.slane %v107_v33, %v142_v27 }
  0xbe   :  { %v149_v38 = vsel %vm148_vm2, %v147_v37, %v143_v35  ;;  %v236_v39 = vsel %vm148_vm2, %v235_v36, %v231_v34 }
  0xbf   :  { %368 = vmatmul.mubr.msk.f32.vlgmr.msra.gmra.mxu0 %vm150_vm3, %v149_v38  ;;  %373 = vmatmul.mubr.msk.f32.vlgmr.msra.gmra.mxu1 %vm150_vm3, %v236_v39 }
 0x17f   :  { %v222_v41 = vpop.f32.mrf.mxu0  ;;  %v305_v42 = vpop.f32.mrf.mxu1 }
 0x180   :  { %v223_v43 = vadd.f32 %v356_v40, %v222_v41  ;;  %v306_v44 = vadd.f32 %v356_v40, %v305_v42 }
 0x181   :  { %v369_v45 = vpop.f32.mrf.mxu0  ;;  %v374_v46 = vpop.f32.mrf.mxu1 }
 0x182   :  { %v317_v47 = vmul.f32 %v306_v44, %v306_v44  ;;  %v309_v48 = vmul.f32 %v223_v43, %v223_v43 }
 0x184   :  { %v318_v49 = vsel %vm310_vm4, %v317_v47, 0.0  ;;  %v311_v50 = vsel %vm310_vm4, %v309_v48, 0.0 }
 0x185   :  { %319 = vadd.xlane.f32.xlu1 %v318_v49  ;;  %312 = vadd.xlane.f32.xlu0 %v311_v50 }
 0x20e   :  { %v320_v51 = vpop.xlane.xlu1 %319  ;;  %v313_v52 = vpop.xlane.xlu0 %312 }
 0x20f   :  { %v321_v53 = vmax.f32 %v320_v51, 1e-24  ;;  %v314_v54 = vmax.f32 %v313_v52, 1e-24 }
 0x211   :  { %388 = vrsqrt.f32 %v321_v53 }
 0x212   :  { %390 = vrsqrt.f32 %v314_v54 }
 0x21e   :  { %v389_v55 = vpop.eup %388 }
 0x21f   :  { %v391_v56 = vpop.eup %390  ;;  %v323_v57 = vmul.f32 %v389_v55, %v306_v44 }
 0x220   :  { %v316_v58 = vmul.f32 %v391_v56, %v223_v43 }
 0x221   :  { %325 = vst [vmem:[#allocation11] sm:$0x3] %v323_v57 }
 0x222   :  { %324 = vst [vmem:[#allocation10] sm:$0x3] %v316_v58 }
 0x223   :  { %463 = shalt.err (!%p460_p5)
}
 0x224   :  { %345 = dma.vmem_to_hbm [thread:$0]  %s343_s9, 32, %s572_s5, [#allocation12]  }
 0x225   :  { %s472_s15 = scalar_lea.vmem %s333_s11, 32  ;;  %p477_p7 = scmp.lt.s32.totalorder %s333_s11, %s333_s11 }
 0x226   :  { %p473_p6 = scmp.ne.s32.totalorder %s333_s11, %s472_s15  ;;  %p478_p8 = scmp.lt.s32.totalorder %s472_s15, %s472_s15 }
 0x228   :  { %p479_p9 = por %p478_p8, %p477_p7 }
 0x22a   :  { %p480_p10 = pnand %p479_p9, %p473_p6 }
 0x22c   :  { %483 = shalt.err (!%p480_p10)
}
 0x22d   :  { %335 = dma.vmem_to_hbm [thread:$0]  %s333_s11, 32, %s571_s4, [#allocation6]  }
 0x22e   :  { %496 = dma.done.wait [#allocation6], 32  }
 0x22f   :  { %497 = vsyncadd [#allocation6], 4294967264 }
 0x230   :  { %498 = dma.done.wait [#allocation12], 32  }
 0x231   :  { %499 = vsyncadd [#allocation12], 4294967264 }
 0x232   :  { %352 = vsyncpa [#allocation5], 1 }
 0x233   :  { %353 = vsyncpa [#allocation8], 1 }
 0x234   :  { %354 = vsyncpa [#allocation6], 1 }
 0x235   :  { %355 = vsyncpa [#allocation12], 1 }

</bundles_post_ra>
